<compile_context>
chip_gen: v6e
topology: v6e:2x2x1
jax: 0.10.0
libtpu: 0.0.40
codegen_flags: <defaults>
</compile_context>

<pallas_src>
import jax
import jax.numpy as jnp
from jax.experimental import pallas as pl
from jax.experimental.pallas import tpu as pltpu


def _round_up(x, m):
    return ((x + m - 1) // m) * m


def velo_loss(v, best_v=90.0, target_block_bytes=2 * 1024 * 1024):
    """Pallas TPU implementation of VeloLoss.forward(v).  v: (N, D) float."""
    n, d = v.shape
    if d > 128:
        # TODO(synk): D > 128 needs a different (per-row reduce) tiling.
        raise NotImplementedError("velo_loss kernel supports D <= 128")

    # Pad D up to a power of two (a divisor of 128) so every sample occupies a
    # lane-aligned group in the flat slab.  Zero features do not change the
    # norm.  The common case (D already a power of two) is copy-free.
    d_pad = 1 if d <= 1 else 1 << (d - 1).bit_length()
    if d_pad != d:
        v = jnp.pad(v, ((0, 0), (0, d_pad - d)))

    flat = v.reshape(-1)
    rem = flat.shape[0] % 128
    if rem:
        flat = jnp.pad(flat, (0, 128 - rem))          # tiny tail only
    slab = flat.reshape(-1, 128)                       # (rows, 128), lane dense
    rows = slab.shape[0]
    spr = 128 // d_pad                                 # samples per 128-lane row

    itemsize = jnp.dtype(slab.dtype).itemsize
    # Row-block size: ~target_block_bytes, multiple of 8 sublanes, and at
    # least two blocks when possible so both v7x TensorCores get work.
    target_rows = max(8, (target_block_bytes // (128 * itemsize)) // 8 * 8)
    tile_rows = min(target_rows, _round_up(pl.cdiv(rows, 2), 8))
    if tile_rows >= rows:
        tile_rows = rows                               # single full-dim block
    num_blocks = pl.cdiv(rows, tile_rows)
    tiles_per_core = pl.cdiv(num_blocks, 2)

    # Does the last block contain sample slots that are not real samples
    # (flat zero padding and/or out-of-bounds rows of a partial block)?
    tail_mask_needed = (num_blocks * tile_rows * spr) != n
    # Are there (clamped) duplicate blocks because num_blocks is odd?
    need_block_guard = (2 * tiles_per_core) != num_blocks

    best_v_f = float(best_v)

    def kernel(x_ref, out_ref):
        c = pl.program_id(0)                 # TensorCore split ("parallel")
        t = pl.program_id(1)                 # sequential tiles ("arbitrary")
        gb = c * tiles_per_core + t          # global row-block index

        @pl.when(t == 0)
        def _init():
            out_ref[...] = jnp.zeros_like(out_ref)

        x = x_ref[...].astype(jnp.float32)   # (tile_rows, 128)
        s = x * x
        shift = 1
        while shift < d_pad:                 # log2(d_pad) XLU lane rotations
            s = s + pltpu.roll(s, shift, axis=1)
            shift *= 2
        # Lane g*d_pad + d_pad - 1 of every row now holds that sample's
        # ||v||^2; other lanes hold partial sums and are ignored later.
        diff = jnp.sqrt(s) - jnp.float32(best_v_f)
        sqd = diff * diff

        def accumulate(vals):
            out_ref[0] = out_ref[0] + jnp.sum(vals, axis=0, keepdims=True)

        if tail_mask_needed:
            last = num_blocks - 1

            @pl.when(gb == last)
            def _ragged_tail():
                row = jax.lax.broadcasted_iota(jnp.int32, sqd.shape, 0)
                lane = jax.lax.broadcasted_iota(jnp.int32, sqd.shape, 1)
                sample = (gb * tile_rows + row) * spr + lane // d_pad
                accumulate(jnp.where(sample < n, sqd, 0.0))

            @pl.when(gb < last)
            def _full_block():
                accumulate(sqd)
        elif need_block_guard:
            @pl.when(gb < num_blocks)
            def _guarded_block():
                accumulate(sqd)
        else:
            accumulate(sqd)

    def in_index_map(c, t):
        # Clamp so the (possibly duplicate) extra step of an odd block count
        # stays in bounds; its contribution is skipped inside the kernel.
        return (jnp.minimum(c * tiles_per_core + t, num_blocks - 1), 0)

    padded_tile_rows = _round_up(tile_rows, 8)
    in_block_bytes = padded_tile_rows * 128 * itemsize
    f32_block_bytes = padded_tile_rows * 128 * 4
    vmem_limit = int(min(48 * 1024 * 1024,
                         2 * in_block_bytes + 8 * f32_block_bytes + (8 << 20)))

    partials = pl.pallas_call(
        kernel,
        grid=(2, tiles_per_core),
        in_specs=[pl.BlockSpec((tile_rows, 128), in_index_map)],
        out_specs=pl.BlockSpec((1, 1, 128), lambda c, t: (c, 0, 0)),
        out_shape=jax.ShapeDtypeStruct((2, 1, 128), jnp.float32),
        compiler_params=pltpu.CompilerParams(
            dimension_semantics=("parallel", "arbitrary"),
            vmem_limit_bytes=vmem_limit,
        ),
        cost_estimate=pl.CostEstimate(
            flops=(5 + max(1, d_pad.bit_length() - 1)) * rows * 128,
            transcendentals=rows * 128,
            bytes_accessed=rows * 128 * itemsize + 2 * 128 * 4,
        ),
    )(slab)

    # Pick out the one valid lane per d_pad-lane group and finish the mean.
    lane = jnp.arange(128, dtype=jnp.int32)
    result_lane = (lane % d_pad) == (d_pad - 1)
    total = jnp.sum(jnp.where(result_lane, partials, jnp.float32(0.0)))
    return total / jnp.float32(n)


def velo_loss_ref(v, best_v=90.0):
    """Pure-JAX reference matching the PyTorch semantics."""
    v = v.astype(jnp.float32)
    v_val = jnp.sqrt(jnp.sum(v * v, axis=1))
    v_diff = v_val - best_v
    return jnp.mean(v_diff * v_diff)


if __name__ == "__main__":
    key = jax.random.PRNGKey(0)
    k1, k2, k3, k4 = jax.random.split(key, 4)

    # Case 1: zero-copy path (N*D multiple of 128), single block, no tail.
    v1 = jax.random.normal(k1, (256, 4), dtype=jnp.float32) * 30.0 + 60.0
    out1 = jax.block_until_ready(velo_loss(v1))
    ref1 = velo_loss_ref(v1)
    assert jnp.allclose(out1, ref1, rtol=1e-4), (out1, ref1)

    # Case 2: ragged tail (N*D not a multiple of 128) -> masked last block.
    v2 = jax.random.normal(k2, (300, 4), dtype=jnp.float32) * 30.0 + 60.0
    out2 = jax.block_until_ready(velo_loss(v2))
    ref2 = velo_loss_ref(v2)
    assert jnp.allclose(out2, ref2, rtol=1e-4), (out2, ref2)

    # Case 3: feature dim that is not a power of two (D=3 -> padded to 4).
    v3 = jax.random.normal(k3, (192, 3), dtype=jnp.float32) * 30.0 + 60.0
    out3 = jax.block_until_ready(velo_loss(v3))
    ref3 = velo_loss_ref(v3)
    assert jnp.allclose(out3, ref3, rtol=1e-4), (out3, ref3)

    # Case 4: several row-blocks per core (tiny blocks to exercise the
    # accumulation loop and the 2-TensorCore split).
    v4 = jax.random.normal(k4, (4096, 4), dtype=jnp.float32) * 30.0 + 60.0
    out4 = jax.block_until_ready(velo_loss(v4, target_block_bytes=16 * 1024))
    ref4 = velo_loss_ref(v4)
    assert jnp.allclose(out4, ref4, rtol=1e-4), (out4, ref4)

    print("KERNEL_OK")
</pallas_src>

<mosaic_0001>
module attributes {stable_mosaic.version = 11 : i64} {
  func.func @kernel(%arg0: i32, %arg1: i32, %arg2: memref<8x128xf32, #tpu.memory_space<vmem>>, %arg3: memref<1x1x128xf32, #tpu.memory_space<vmem>>) attributes {dimension_semantics = [#tpu.dimension_semantics<parallel>, #tpu.dimension_semantics<arbitrary>], iteration_bounds = array<i64: 2, 1>, scalar_prefetch = 0 : i64, scratch_operands = 0 : i64, tpu.core_type = #tpu.core_type<tc>, window_params = [{transform_indices = @transform_0, window_bounds = array<i64: 8, 128>}, {transform_indices = @transform_1, window_bounds = array<i64: 1, 1, 128>}]} {
    %c1_i32 = arith.constant 1 : i32
    %0 = arith.muli %arg0, %c1_i32 : i32
    %1 = arith.addi %0, %arg1 : i32
    %c0_i32 = arith.constant 0 : i32
    %2 = arith.cmpi eq, %arg1, %c0_i32 : i32
    %3 = arith.extui %2 : i1 to i32
    %c0_i32_0 = arith.constant 0 : i32
    %4 = arith.cmpi ne, %3, %c0_i32_0 : i32
    scf.if %4 {
      %cst_5 = arith.constant 0.000000e+00 : f32
      %18 = vector.broadcast %cst_5 : f32 to vector<1x1x128xf32>
      %c0_6 = arith.constant 0 : index
      %c0_7 = arith.constant 0 : index
      %c0_8 = arith.constant 0 : index
      %19 = vector.load %arg3[%c0_6, %c0_7, %c0_8] : memref<1x1x128xf32, #tpu.memory_space<vmem>>, vector<1x1x128xf32>
      tpu.vector_store %arg3[%c0_6, %c0_7, %c0_8], %18 {strides = array<i32>} : memref<1x1x128xf32, #tpu.memory_space<vmem>>, vector<1x1x128xf32>,
    } else {
    }
    %c0 = arith.constant 0 : index
    %c0_1 = arith.constant 0 : index
    %5 = vector.load %arg2[%c0, %c0_1] : memref<8x128xf32, #tpu.memory_space<vmem>>, vector<8x128xf32>
    %6 = arith.mulf %5, %5 : vector<8x128xf32>
    %c1_i32_2 = arith.constant 1 : i32
    %7 = tpu.dynamic_rotate %6 by %c1_i32_2 dim 1 : vector<8x128xf32>, i32 -> vector<8x128xf32>
    %8 = arith.addf %6, %7 : vector<8x128xf32>
    %c2_i32 = arith.constant 2 : i32
    %9 = tpu.dynamic_rotate %8 by %c2_i32 dim 1 : vector<8x128xf32>, i32 -> vector<8x128xf32>
    %10 = arith.addf %8, %9 : vector<8x128xf32>
    %11 = math.sqrt %10 : vector<8x128xf32>
    %cst = arith.constant 9.000000e+01 : f32
    %12 = vector.broadcast %cst : f32 to vector<8x128xf32>
    %13 = arith.subf %11, %12 : vector<8x128xf32>
    %14 = arith.mulf %13, %13 : vector<8x128xf32>
    %c1_i32_3 = arith.constant 1 : i32
    %15 = arith.cmpi slt, %1, %c1_i32_3 : i32
    %16 = arith.extui %15 : i1 to i32
    %c0_i32_4 = arith.constant 0 : i32
    %17 = arith.cmpi ne, %16, %c0_i32_4 : i32
    scf.if %17 {
      %c0_5 = arith.constant 0 : index
      %c0_6 = arith.constant 0 : index
      %c0_7 = arith.constant 0 : index
      %18 = vector.load %arg3[%c0_5, %c0_6, %c0_7] : memref<1x1x128xf32, #tpu.memory_space<vmem>>, vector<1x1x128xf32>
      %19 = vector.shape_cast %18 : vector<1x1x128xf32> to vector<1x128xf32>
      %cst_8 = arith.constant dense<0.000000e+00> : vector<128xf32>
      %20 = vector.multi_reduction <add>, %14, %cst_8 [0] : vector<8x128xf32> to vector<128xf32>
      %21 = vector.shape_cast %20 : vector<128xf32> to vector<1x128xf32>
      %22 = arith.addf %19, %21 : vector<1x128xf32>
      %c0_9 = arith.constant 0 : index
      %c0_10 = arith.constant 0 : index
      %c0_11 = arith.constant 0 : index
      %23 = vector.load %arg3[%c0_9, %c0_10, %c0_11] : memref<1x1x128xf32, #tpu.memory_space<vmem>>, vector<1x1x128xf32>
      %24 = vector.shape_cast %23 : vector<1x1x128xf32> to vector<1x128xf32>
      %25 = vector.shape_cast %22 : vector<1x128xf32> to vector<1x1x128xf32>
      tpu.vector_store %arg3[%c0_9, %c0_10, %c0_11], %25 {strides = array<i32>} : memref<1x1x128xf32, #tpu.memory_space<vmem>>, vector<1x1x128xf32>,
    } else {
    }
    return
  }
  func.func @transform_0(%arg0: i32, %arg1: i32) -> (i32, i32) {
    %c1_i32 = arith.constant 1 : i32
    %0 = arith.muli %arg0, %c1_i32 : i32
    %1 = arith.addi %0, %arg1 : i32
    %c0_i32 = arith.constant 0 : i32
    %2 = arith.minsi %1, %c0_i32 : i32
    %c0_i32_0 = arith.constant 0 : i32
    %c0_i32_1 = arith.constant 0 : i32
    return %2, %c0_i32_0 : i32, i32
  }
  func.func @transform_1(%arg0: i32, %arg1: i32) -> (i32, i32, i32) {
    %c0_i32 = arith.constant 0 : i32
    %c0_i32_0 = arith.constant 0 : i32
    %c0_i32_1 = arith.constant 0 : i32
    return %arg0, %c0_i32, %c0_i32_0 : i32, i32, i32
  }
}

</mosaic_0001>

<bundles_post_ra>
// kernel: tpu_custom_call.1
= control target key start
LH: loop header
LB: loop body
LE: loop exit
PB: predicated region body
PF: predicated region fallthrough
CT: control target
= control target key end

     0   :  { %6 = vsyncpa [#allocation3], 0  ;;  %s688_s0 = inlined_call_operand.hbm [shape: f32[8,128], index: 0, kind: input, shape index: {}]   ;;  %s689_s1 = inlined_call_operand.hbm [shape: f32[2,1,128], index: 1, kind: output, shape index: {}]  }
   0x1   :  { %8 = vsyncpa [#allocation3 + $0x1], 0 }
   0x2   :  { %9 = vsyncpa [#allocation4], 0 }
   0x3   :  { %11 = vsyncpa [#allocation4 + $0x1], 0  ;;  %s528_s6 = smov 0   ;;  %s530_s7 = smov 0  }
   0x4   :  { %s532_s8 = smov 0   ;;  %s534_s9 = smov 0  }
   0x5   :  { %s536_s10 = smov 0   ;;  %s538_s11 = smov 0  }
   0x6   :  { %s540_s12 = smov 0   ;;  %s542_s13 = smov 0  }
   0x7 LB: > { %s278_s14 = sadd.s32 4294967295, %s511_s13   ;;  %s279_s15 = sadd.s32 4294967294, %s511_s13   ;;  %s511_s13 = sphi %s542_s13, %s17_s13   ;;  %s507_s12 = sphi %s540_s12, %s708_s12   ;;  %s503_s11 = sphi %s538_s11, %s707_s11   ;;  %s499_s10 = sphi %s536_s10, %s678_s10   ;;  %s495_s9 = sphi %s534_s9, %s706_s9   ;;  %s491_s8 = sphi %s532_s8, %s705_s8   ;;  %s487_s7 = sphi %s530_s7, %s704_s7   ;;  %s483_s6 = sphi %s528_s6, %s703_s6  }
   0x8   : > { %s29_s16 = sadd.s32 1, %s507_s12  ;;  %p480_p1 = scmp.ne.s32.totalorder %s499_s10, 0 }
   0x9   : > { %p31_p0 = scmp.ge.s32.totalorder %s29_s16, 2  ;;  %p50_p2 = scmp.eq.s32.totalorder %s511_s13, 0 }
   0xa   : > { %p55_p3 = scmp.ne.s32.totalorder %s499_s10, %s495_s9  ;;  %p56_p5 = scmp.eq.s32.totalorder %s278_s14, 0 }
   0xb   : > { %s710_s16 = smov (%p31_p0, %s29_s16), 0  ;;  %p574_p4 = por %p480_p1, %p50_p2 }
   0xc   : > { %p578_p6 = por %p56_p5, %p55_p3  ;;  %s65_s19 = ssub.s32 %s507_s12, %s710_s16 }
   0xd   : > { %p66_p7 = scmp.eq.s32.totalorder %s65_s19, 0  ;;  %s68_s20 = sadd.s32 1, %s491_s8 }
   0xe   : > { %s693_s18 = scalar_select %p578_p6, 1, 0 }
   0xf   : > { %s586_s21 = scalar_select %p66_p7, %s491_s8, %s68_s20  }
  0x10   : > { %p78_p8 = scmp.ne.s32.totalorder %s491_s8, %s487_s7  ;;  %p79_p9 = scmp.eq.s32.totalorder %s278_s14, 1 }
  0x11   : > { %p84_p10 = scmp.ne.s32.totalorder %s487_s7, %s483_s6  ;;  %p85_p11 = scmp.eq.s32.totalorder %s279_s15, 1 }
  0x12   : > { %p592_p12 = por %p79_p9, %p78_p8  ;;  %p303_p1 = scmp.lt.s32.totalorder %s511_s13, 2 }
  0x13   : > { %p597_p0 = por %p85_p11, %p84_p10  ;;  %s513_s24 = smov [#allocation2]  }
  0x14   : > { %s694_s22 = scalar_select %p592_p12, 1, 0 }
  0x15   : > { %s695_s23 = scalar_select %p597_p0, 1, 0 }
  0x16   : > { %s119_s25 = sshll.u32 %s513_s24, 4  ;;  %p604_p2 = pnand %p303_p1, %p574_p4  ;;  %s120_s25 = int_to_ptr.vmem [resolvable:$true] %s119_s25 }
  0x17   : > { %s382_s29 = scalar_lea.hbm %s688_s0, 128 }
  0x18   : > { %p383_p7 = scmp.ne.s32.totalorder %s688_s0, %s382_s29  ;;  %p384_p8 = pneg %p604_p2 }
  0x19   : > { %p389_p4 = scmp.lt.s32.totalorder %s382_s29, %s382_s29 }
  0x1a   : > { %p385_p9 = pnand %p384_p8, %p383_p7 }
  0x1c   : > { %p386_p10 = pneg %p385_p9 }
  0x1e   : > { %p391_p11 = pnand %p389_p4, %p386_p10 }
  0x20   : > { %394 = shalt.err (!%p391_p11)
}
  0x21   : > { %s395_s3 = scalar_lea.vmem %s120_s25, 128  ;;  %s402_s4 = scalar_lea.vmem %s120_s25, 256 }
  0x22   : > { %p396_p1 = scmp.ne.s32.totalorder %s120_s25, %s395_s3  ;;  %p403_p5 = scmp.lt.s32.totalorder %s120_s25, %s120_s25 }
  0x23   : > { %p404_p0 = scmp.lt.s32.totalorder %s402_s4, %s395_s3 }
  0x24   : > { %p398_p13 = pnand %p396_p1, %p384_p8 }
  0x25   : > { %p405_p12 = por %p404_p0, %p403_p5 }
  0x26   : > { %p399_p3 = pneg %p398_p13 }
  0x28   : > { %p406_p6 = pnand %p405_p12, %p399_p3 }
  0x2a   : > { %409 = shalt.err (!%p406_p6)
}
  0x2b   : > { %298 = dma.hbm_to_vmem [thread:$0]  (!%p604_p2), %s688_s0, 128, %s120_s25, [#allocation3]  }
  0x2c   : > { %p697_p7 = scmp.lt.s32.totalorder %s511_s13, 3  ;;  %p698_p9 = scmp.ge.s32.totalorder %s511_s13, 1 }
  0x2e   : > { %p125_p10 = pnand %p698_p9, %p697_p7 }
  0x2f   : > { %s130_s14 = sand.u32 (!%p125_p10), 1, %s499_s10   ;;  %p699_p12 = scmp.ne.s32.totalorder (!%p125_p10), %s693_s18, 0 }
  0x30   : > { %128 = sbr.rel (%p125_p10) target bundleno = 352 (0x160), region = 24  ;;  %s285_s15 = sshll.u32 (!%p125_p10), %s130_s14, 3 }
  0x31   : > { %s131_s17 = scalar_lea.sflag (!%p125_p10), [#allocation3], %s130_s14  ;;  %s134_s19 = scalar_lea.vmem (!%p125_p10), [#allocation2], %s285_s15 }
  0x35   : > { %473 = dma.done.wait (%p699_p12), %s131_s17, 128  }
  0x36   : > { %475 = vsyncadd (%p699_p12), %s131_s17, 4294967168  ;;  %s150_s20 = sand.u32 1, %s487_s7   ;;  %v514_v0 = vmov 0.0   ;;  %v161_v1 = vld [vmem:[%s134_s19] sm:$0xff]  ;;  %s515_s25 = smov 1  }
  0x37   : > { %s635_s24 = scalar_lea.vmem [#allocation5], %s150_s20  ;;  %v162_v2 = vmul.f32 %v161_v1, %v161_v1  ;;  %s516_s26 = smov 2  }
  0x38   : > { %160 = vst [vmem:[%s635_s24] sm:$0x1] %v514_v0  ;;  %p287_p6 = scmp.ge.s32.totalorder %s503_s11, 1 }
  0x39   : > { %163 = vrot.lane.b32.xlu0 %v162_v2, %s515_s25 }
  0xab   : > { %v164_v3 = vpop.permute.xlu0 %163 }
  0xac   : > { %v165_v4 = vadd.f32 %v164_v3, %v162_v2 }
  0xae   : > { %166 = vrot.lane.b32.xlu0 %v165_v4, %s516_s26 }
 0x120   : > { %v167_v5 = vpop.permute.xlu0 %166 }
 0x121   : > { %v168_v6 = vadd.f32 %v167_v5, %v165_v4 }
 0x123   : > { %380 = vrsqrt.f32 %v168_v6  ;;  %vm171_vm0 = vcmp.eq.f32.partialorder %v168_v6, inf  ;;  %v174_v9 = vand.u32 2147483648, %v168_v6  ;;  %vm173_vm1 = vcmp.eq.f32.partialorder %v168_v6, 0.0 }
 0x130   : > { %v381_v7 = vpop.eup %380 }
 0x131   : > { %v170_v8 = vmul.f32 %v381_v7, %v168_v6 }
 0x133   : > { %v172_v10 = vsel %vm171_vm0, %v168_v6, %v170_v8  ;;  %181 = sbr.rel (%p287_p6) target bundleno = 328 (0x148), region = 36 }
 0x134   : > { %v175_v11 = vsel %vm173_vm1, %v174_v9, %v172_v10 }
 0x135   : > { %v286_v12 = vadd.f32 -90.0, %v175_v11 }
 0x137   : > { %v177_v13 = vmul.f32 %v286_v12, %v286_v12 }
 0x138   : > { %v182_v19 = vld [vmem:[%s635_s24] sm:$0x1] }
 0x139   : > { %v183_v14 = vrot.slane %v177_v13, 4 }
 0x13b   : > { %v184_v15 = vadd.f32 %v183_v14, %v177_v13 }
 0x13d   : > { %v185_v16 = vrot.slane %v184_v15, 2 }
 0x13f   : > { %v186_v17 = vadd.f32 %v185_v16, %v184_v15 }
 0x141   : > { %v187_v18 = vrot.slane %v186_v17, 1 }
 0x143   : > { %v188_v20 = vadd.f32 %v187_v18, %v186_v17 }
 0x145   : > { %v189_v21 = vadd.f32 %v188_v20, %v182_v19 }
 0x147   : > { %190 = vst [vmem:[%s635_s24] sm:$0x1] %v189_v21 }
 0x148 PF: > { %s288_s18 = sshll.u32 %s503_s11, 4  ;;  %s204_s30 = sshll.u32 %s635_s24, 4  ;;  %s205_s30 = int_to_ptr.vmem [resolvable:$true] %s204_s30 }
 0x149   : > { %s202_s29 = scalar_lea.hbm %s689_s1, %s288_s18  ;;  %s192_s2 = scalar_lea.sflag [#allocation4], %s150_s20 }
 0x14a   : > { %s410_s3 = scalar_lea.vmem %s205_s30, 16  ;;  %p700_p0 = scmp.ne.s32.totalorder %s694_s22, 0 }
 0x14b   : > { %p411_p13 = scmp.ne.s32.totalorder %s205_s30, %s410_s3  ;;  %s517_s4 = smov [#allocation5]  }
 0x14c   : > { %s414_s5 = sshll.u32 %s517_s4, 4  ;;  %s415_s5 = int_to_ptr.vmem [resolvable:$false] %s414_s5 }
 0x14d   : > { %p412_p2 = pnand %p411_p13, %p700_p0  ;;  %s416_s9 = scalar_lea.vmem %s415_s5, 32 }
 0x14e   : > { %p417_p5 = scmp.lt.s32.totalorder %s205_s30, %s415_s5  ;;  %p418_p8 = scmp.lt.s32.totalorder %s416_s9, %s410_s3 }
 0x14f   : > { %p413_p3 = pneg %p412_p2 }
 0x150   : > { %p419_p4 = por %p418_p8, %p417_p5 }
 0x152   : > { %p420_p11 = pnand %p419_p4, %p413_p3 }
 0x154   : > { %423 = shalt.err (!%p420_p11)
}
 0x155   : > { %s424_s11 = scalar_lea.hbm %s202_s29, 16  ;;  %s428_s17 = scalar_lea.hbm %s689_s1, 32 }
 0x156   : > { %p425_p1 = scmp.ne.s32.totalorder %s202_s29, %s424_s11  ;;  %p429_p10 = scmp.lt.s32.totalorder %s202_s29, %s689_s1 }
 0x157   : > { %p430_p12 = scmp.lt.s32.totalorder %s428_s17, %s424_s11 }
 0x158   : > { %p426_p7 = pnand %p425_p1, %p700_p0 }
 0x159   : > { %p431_p6 = por %p430_p12, %p429_p10 }
 0x15a   : > { %p427_p9 = pneg %p426_p7 }
 0x15c   : > { %p432_p13 = pnand %p431_p6, %p427_p9 }
 0x15e   : > { %435 = shalt.err (!%p432_p13)
}
 0x15f   : > { %293 = dma.vmem_to_hbm [thread:$0]  (%p700_p0), %s205_s30, 16, %s202_s29, %s192_s2  }
 0x160 PF: > { %s216_s24 = sand.u32 1, %s483_s6   ;;  %p701_p2 = scmp.ne.s32.totalorder %s695_s23, 0 }
 0x161   : > { %p702_p3 = scmp.ge.s32.totalorder %s511_s13, 2  ;;  %s217_s25 = scalar_lea.sflag [#allocation4], %s216_s24 }
 0x163   : > { %p300_p5 = pnand %p702_p3, %p701_p2 }
 0x165   : > { %p301_p8 = pneg %p300_p5 }
 0x167   : > { %477 = dma.done.wait (%p301_p8), %s217_s25, 16  }
 0x168   : > { %479 = vsyncadd (%p301_p8), %s217_s25, 4294967280  ;;  %s17_s13 = sadd.s32 1, %s511_s13   ;;  %s703_s6 = smov %s487_s7 }
 0x169   : > { %p14_p4 = scmp.ge.s32.totalorder %s17_s13, 4   ;;  %s704_s7 = smov %s491_s8 }
 0x16a   : > { %s705_s8 = smov %s586_s21  ;;  %s706_s9 = smov %s499_s10 }
 0x16b   : > { %s678_s10 = smov 0   ;;  %s707_s11 = smov %s507_s12 }
 0x16c   : > { %s708_s12 = smov %s710_s16  ;;  %16 = sbr.rel (!%p14_p4) target bundleno = 7 (0x7), region = 77 }
 0x171   :  { %221 = vsyncpa [#allocation3], 1 }
 0x172   :  { %223 = vsyncpa [#allocation3 + $0x1], 1 }
 0x173   :  { %224 = vsyncpa [#allocation4], 1 }
 0x174   :  { %226 = vsyncpa [#allocation4 + $0x1], 1 }

</bundles_post_ra>
